<compile_context>
chip_gen: v5e
topology: v5e:2x2
jax: 0.10.0
libtpu: 0.0.40
codegen_flags: <defaults>
</compile_context>

<pallas_src>
import functools
import math

import jax
import jax.numpy as jnp
from jax import lax
from jax.experimental import pallas as pl
from jax.experimental.pallas import tpu as pltpu


_VMEM_LIMIT_BYTES = 32 * 1024 * 1024     # explicit scoped-VMEM request (safe on v5e/v6e/v7x)


def _round_up(x, m):
    return ((x + m - 1) // m) * m


def _divisor_tiles(total_p):
    """All multiple-of-128 tile sizes that evenly divide total_p, descending."""
    q = total_p // 128
    return [128 * d for d in range(q, 0, -1) if q % d == 0]


# ---------------------------------------------------------------------------
# Kernels (x arrives f32 and is cast to bf16 in-kernel; weight is pre-cast bf16)
# ---------------------------------------------------------------------------
def _mm_kernel_resident(x_ref, wt_ref, o_ref):
    # whole-K weight block: single dot, no reduction axis, no accumulator.
    o_ref[...] = jnp.dot(x_ref[...].astype(jnp.bfloat16), wt_ref[...],
                         preferred_element_type=jnp.float32)


def _mm_bias_kernel_resident(x_ref, wt_ref, b_ref, o_ref):
    o_ref[...] = (jnp.dot(x_ref[...].astype(jnp.bfloat16), wt_ref[...],
                          preferred_element_type=jnp.float32)
                  + b_ref[...])


def _mm_kernel_ktiled(x_ref, wt_ref, o_ref):
    # accumulate directly into the resident f32 output block (no scratch).
    @pl.when(pl.program_id(2) == 0)
    def _init():
        o_ref[...] = jnp.zeros_like(o_ref)

    o_ref[...] += jnp.dot(x_ref[...].astype(jnp.bfloat16), wt_ref[...],
                          preferred_element_type=jnp.float32)


def _mm_bias_kernel_ktiled(x_ref, wt_ref, b_ref, o_ref):
    @pl.when(pl.program_id(2) == 0)
    def _init():
        o_ref[...] = jnp.zeros_like(o_ref)

    o_ref[...] += jnp.dot(x_ref[...].astype(jnp.bfloat16), wt_ref[...],
                          preferred_element_type=jnp.float32)

    @pl.when(pl.program_id(2) == pl.num_programs(2) - 1)
    def _bias():
        o_ref[...] += b_ref[...]


# ---------------------------------------------------------------------------
# pallas_call builder (operands already padded to tile multiples)
# ---------------------------------------------------------------------------
def _pallas_matmul(x_p, wt_p, bias_p, *, tm, tn, tk):
    Mp, Kp = x_p.shape
    Np = wt_p.shape[1]
    has_bias = bias_p is not None
    k_resident = (tk == Kp)

    if k_resident:
        grid = (Mp // tm, Np // tn)
        in_specs = [pl.BlockSpec((tm, Kp), lambda i, j: (i, 0)),
                    pl.BlockSpec((Kp, tn), lambda i, j: (0, j))]
        if has_bias:
            in_specs.append(pl.BlockSpec((1, tn), lambda i, j: (0, j)))
        out_spec = pl.BlockSpec((tm, tn), lambda i, j: (i, j))
        kernel = _mm_bias_kernel_resident if has_bias else _mm_kernel_resident
        dims = ("parallel", "parallel")
    else:
        grid = (Mp // tm, Np // tn, Kp // tk)          # K (reduction) last
        in_specs = [pl.BlockSpec((tm, tk), lambda i, j, k: (i, k)),
                    pl.BlockSpec((tk, tn), lambda i, j, k: (k, j))]
        if has_bias:
            in_specs.append(pl.BlockSpec((1, tn), lambda i, j, k: (0, j)))
        out_spec = pl.BlockSpec((tm, tn), lambda i, j, k: (i, j))
        kernel = _mm_bias_kernel_ktiled if has_bias else _mm_kernel_ktiled
        dims = ("parallel", "parallel", "arbitrary")

    operands = (x_p, wt_p, bias_p) if has_bias else (x_p, wt_p)
    return pl.pallas_call(
        kernel,
        out_shape=jax.ShapeDtypeStruct((Mp, Np), jnp.float32),
        grid=grid,
        in_specs=in_specs,
        out_specs=out_spec,
        compiler_params=pltpu.CompilerParams(
            dimension_semantics=dims,
            vmem_limit_bytes=_VMEM_LIMIT_BYTES),
    )(*operands)


# ---------------------------------------------------------------------------
# jitted end-to-end paths (pad -> pallas_call -> slice; single dispatch)
# ---------------------------------------------------------------------------
def _linear_core(x, wt_p, bias_p, *, tm, tn, tk, n_out):
    M, K = x.shape
    Kp = wt_p.shape[0]
    Mp = _round_up(M, tm)
    x = x.astype(jnp.float32)                 # bf16 cast happens in-kernel
    if (Mp, Kp) != (M, K):
        x = jnp.pad(x, ((0, Mp - M), (0, Kp - K)))
    out_p = _pallas_matmul(x, wt_p, bias_p, tm=tm, tn=tn, tk=tk)
    return out_p[:M, :n_out]


_linear_jit = jax.jit(_linear_core, static_argnames=("tm", "tn", "tk", "n_out"))


def _delay_step_core(buffer, ptr, spikes, wt_p, bias_p, *, tm, tn, tk, n_out):
    # ring buffer: write at ptr, read at (ptr+1) % D  ->  delay of (D-1) steps,
    # matching torch.roll(buffer, -1)[...]; buffer[-1]=s; out = buffer[0].
    buffer = buffer.at[ptr].set(spikes)
    read_ptr = (ptr + 1) % buffer.shape[0]
    delayed = lax.dynamic_slice_in_dim(buffer, read_ptr, 1, axis=0)     # (1, K)
    out = _linear_core(delayed, wt_p, bias_p, tm=tm, tn=tn, tk=tk, n_out=n_out)
    return buffer, read_ptr, out[0]


_delay_step_jit = jax.jit(_delay_step_core,
                          static_argnames=("tm", "tn", "tk", "n_out"))


# ---------------------------------------------------------------------------
# Weight init (matches torch.nn.init.xavier_uniform_ for a 2D (out, in) weight)
# ---------------------------------------------------------------------------
def xavier_uniform(key, out_size, in_size):
    bound = math.sqrt(6.0 / (in_size + out_size))
    return jax.random.uniform(key, (out_size, in_size), dtype=jnp.float32,
                              minval=-bound, maxval=bound)


# ---------------------------------------------------------------------------
# Module
# ---------------------------------------------------------------------------
class CurrentBasedSynapseJAX:
    """Functional JAX/Pallas port of spikeflow CurrentBasedSynapse."""

    _TM_CAP = 512                       # rows per output tile (adaptive below)
    _TN_CAP = 1024                      # N tile cap
    _TILE_BUDGET_BYTES = 24 * 1024 * 1024   # double-buffered tile footprint budget

    def __init__(self, input_size, output_size, *, bias=False, delay_max=1,
                 key=None):
        self.input_size = input_size
        self.output_size = output_size
        self.delay_max = delay_max

        key = jax.random.PRNGKey(0) if key is None else key
        self.weight = xavier_uniform(key, output_size, input_size)   # (N, K) f32
        self.bias = jnp.zeros((output_size,), jnp.float32) if bias else None

        # --- one-time weight prep (hoisted out of the per-call path) -------
        K, N = input_size, output_size
        self._Kp = _round_up(K, 128)
        self._Np = _round_up(N, 128)
        wt = self.weight.T.astype(jnp.bfloat16)                      # (K, N) bf16
        self._wt_p = jnp.pad(wt, ((0, self._Kp - K), (0, self._Np - N)))
        self._bias_p = self._pad_bias(self.bias)

        if delay_max > 1:
            self.spike_buffer = jnp.zeros((delay_max, input_size), jnp.float32)
            self._ptr = jnp.array(0, jnp.int32)

    # -- helpers -------------------------------------------------------------
    def _pad_bias(self, bias):
        if bias is None:
            return None
        b = bias.reshape(1, self.output_size).astype(jnp.float32)
        return jnp.pad(b, ((0, 0), (0, self._Np - self.output_size)))

    def set_bias(self, bias):
        self.bias = jnp.asarray(bias, jnp.float32).reshape(self.output_size)
        self._bias_p = self._pad_bias(self.bias)

    def _tiles_for(self, M):
        """Pick (tm, tn, tk) for a call with M rows, under a VMEM budget."""
        tm = min(self._TM_CAP, _round_up(max(M, 1), 16))      # bf16 sublane packing
        Mp = _round_up(M, tm)
        single_m = (Mp == tm)

        n_tiles = [t for t in _divisor_tiles(self._Np) if t <= self._TN_CAP]
        if single_m and self._Np // 128 >= 2:
            # v7x megacore: with one M block, make sure the N axis has >= 2 blocks.
            multi = [t for t in n_tiles if self._Np // t >= 2]
            n_tiles = multi + [t for t in n_tiles if self._Np // t < 2]
        k_tiles = _divisor_tiles(self._Kp)     # descending; first == Kp (resident)

        has_bias = self._bias_p is not None

        def footprint(tn, tk):
            f = 2 * (tm * tk * 4) + 2 * (tk * tn * 2) + 2 * (tm * tn * 4)
            if has_bias:
                f += 2 * tn * 4
            return f

        for tk in k_tiles:                      # prefer whole-K resident, then big tk
            for tn in n_tiles:
                if footprint(tn, tk) <= self._TILE_BUDGET_BYTES:
                    return tm, tn, tk, Mp
        return tm, 128, 128, Mp                 # minimal tiles always fit

    def _linear(self, x):
        """x: (M, input_size) f32 -> (M, output_size) f32 via the Pallas kernel."""
        tm, tn, tk, _ = self._tiles_for(x.shape[0])
        return _linear_jit(x, self._wt_p, self._bias_p,
                           tm=tm, tn=tn, tk=tk, n_out=self.output_size)

    # -- forward -------------------------------------------------------------
    def __call__(self, pre_spikes):
        if self.delay_max > 1:
            # TODO(synk): this stateful per-step path keeps (spike_buffer, ptr) as
            # Python attributes; use forward_sequence() (or thread the state through
            # lax.scan yourself) inside jitted training rollouts.
            s = jnp.asarray(pre_spikes, jnp.float32).reshape(self.input_size)
            tm, tn, tk, _ = self._tiles_for(1)
            self.spike_buffer, self._ptr, out = _delay_step_jit(
                self.spike_buffer, self._ptr, s, self._wt_p, self._bias_p,
                tm=tm, tn=tn, tk=tk, n_out=self.output_size)
            return out

        x = jnp.asarray(pre_spikes)
        squeeze = x.ndim == 1
        if squeeze:
            x = x.reshape(1, -1)
        out = self._linear(x)
        return out[0] if squeeze else out

    def forward_sequence(self, spikes_seq):
        """Batch T timesteps into ONE matmul (the linear layer is time-invariant,
        so the synaptic delay is just an index shift on the input sequence).
        Matches T consecutive __call__ steps, including pre-existing buffer state."""
        spikes_seq = jnp.asarray(spikes_seq, jnp.float32).reshape(-1, self.input_size)
        T = spikes_seq.shape[0]
        D = self.delay_max
        if D > 1:
            ptr = int(self._ptr)
            hist_idx = jnp.array([(ptr + 1 + t) % D for t in range(D - 1)])
            hist = self.spike_buffer[hist_idx]                       # (D-1, K)
            delayed = jnp.concatenate([hist, spikes_seq], axis=0)[:T]
            # update ring state exactly as T per-step writes would have
            n_keep = min(T, D)
            write_idx = jnp.array([(ptr + t) % D for t in range(T - n_keep, T)])
            self.spike_buffer = self.spike_buffer.at[write_idx].set(
                spikes_seq[T - n_keep:])
            self._ptr = jnp.array((ptr + T) % D, jnp.int32)
        else:
            delayed = spikes_seq
        return self._linear(delayed)


# ---------------------------------------------------------------------------
# Demo / correctness check
# ---------------------------------------------------------------------------
if __name__ == "__main__":
    key = jax.random.PRNGKey(0)
    k_w, k_b, k_x, k_d, k_w2, k_x2 = jax.random.split(key, 6)

    # --- small layer, batched path (resident weight, single-shot kernel) ----
    batch, input_size, output_size = 8, 32, 64
    syn = CurrentBasedSynapseJAX(input_size, output_size, bias=False, key=k_w)
    syn_b = CurrentBasedSynapseJAX(input_size, output_size, bias=True, key=k_w)
    syn_b.set_bias(0.1 * jax.random.normal(k_b, (output_size,), jnp.float32))

    pre_spikes = (jax.random.uniform(k_x, (batch, input_size)) < 0.3).astype(
        jnp.float32)

    out = jax.block_until_ready(syn(pre_spikes))
    out_b = jax.block_until_ready(syn_b(pre_spikes))

    # reference vs. the bf16-rounded weight actually fed to the MXU
    # (weights are cast to bf16 once at init; spikes are 0/1 so x is exact)
    w_eff = syn.weight.astype(jnp.bfloat16).astype(jnp.float32)
    ref = pre_spikes @ w_eff.T
    assert out.shape == (batch, output_size)
    assert jnp.allclose(out, ref, atol=1e-4, rtol=1e-4)
    assert jnp.allclose(out_b, ref + syn_b.bias[None, :], atol=1e-4, rtol=1e-4)

    # --- non-multiple-of-128 layer: exercises padding + multi-N-block grid --
    b2, in2, out2 = 40, 200, 500
    syn2 = CurrentBasedSynapseJAX(in2, out2, bias=False, key=k_w2)
    x2 = (jax.random.uniform(k_x2, (b2, in2)) < 0.2).astype(jnp.float32)
    o2 = jax.block_until_ready(syn2(x2))
    w2_eff = syn2.weight.astype(jnp.bfloat16).astype(jnp.float32)
    assert o2.shape == (b2, out2)
    assert jnp.allclose(o2, x2 @ w2_eff.T, atol=1e-4, rtol=1e-4)

    # --- delay path: per-step ring buffer, delay = delay_max - 1 steps ------
    syn_d = CurrentBasedSynapseJAX(input_size, output_size, bias=False,
                                   delay_max=3, key=k_w)
    spikes_t = (jax.random.uniform(k_d, (5, input_size)) < 0.3).astype(jnp.float32)
    outs_d = jnp.stack([syn_d(spikes_t[t]) for t in range(5)])
    jax.block_until_ready(outs_d)
    assert jnp.allclose(outs_d[0], 0.0, atol=1e-6)
    assert jnp.allclose(outs_d[1], 0.0, atol=1e-6)
    assert jnp.allclose(outs_d[2], spikes_t[0] @ w_eff.T, atol=1e-4, rtol=1e-4)
    assert jnp.allclose(outs_d[3], spikes_t[1] @ w_eff.T, atol=1e-4, rtol=1e-4)
    assert jnp.allclose(outs_d[4], spikes_t[2] @ w_eff.T, atol=1e-4, rtol=1e-4)

    # --- time-batched sequence path must match the per-step rollout ---------
    syn_seq = CurrentBasedSynapseJAX(input_size, output_size, bias=False,
                                     delay_max=3, key=k_w)
    outs_seq = jax.block_until_ready(syn_seq.forward_sequence(spikes_t))
    assert outs_seq.shape == (5, output_size)
    assert jnp.allclose(outs_seq, outs_d, atol=1e-4, rtol=1e-4)

    print("KERNEL_OK")
</pallas_src>

<mosaic_0001>
module attributes {stable_mosaic.version = 11 : i64} {
  func.func @_mm_kernel_resident(%arg0: i32, %arg1: i32, %arg2: memref<16x128xf32, #tpu.memory_space<vmem>>, %arg3: memref<128x128xbf16, #tpu.memory_space<vmem>>, %arg4: memref<16x128xf32, #tpu.memory_space<vmem>>) attributes {dimension_semantics = [#tpu.dimension_semantics<parallel>, #tpu.dimension_semantics<parallel>], iteration_bounds = array<i64: 1, 1>, scalar_prefetch = 0 : i64, scratch_operands = 0 : i64, tpu.core_type = #tpu.core_type<tc>, window_params = [{transform_indices = @transform_0, window_bounds = array<i64: 16, 128>}, {transform_indices = @transform_1, window_bounds = array<i64: 128, 128>}, {transform_indices = @transform_2, window_bounds = array<i64: 16, 128>}]} {
    %c0 = arith.constant 0 : index
    %c0_0 = arith.constant 0 : index
    %0 = vector.load %arg2[%c0, %c0_0] : memref<16x128xf32, #tpu.memory_space<vmem>>, vector<16x128xf32>
    %1 = arith.truncf %0 : vector<16x128xf32> to vector<16x128xbf16>
    %c0_1 = arith.constant 0 : index
    %c0_2 = arith.constant 0 : index
    %2 = vector.load %arg3[%c0_1, %c0_2] : memref<128x128xbf16, #tpu.memory_space<vmem>>, vector<128x128xbf16>
    %cst = arith.constant dense<0.000000e+00> : vector<16x128xf32>
    %3 = tpu.matmul %1, %2, %cst {dimension_numbers = #tpu.dot_dimension_numbers<[1], [0], [0], [1], [0, 0, 1, 1], [], []>} : vector<16x128xbf16>, vector<128x128xbf16>, vector<16x128xf32> -> vector<16x128xf32>
    %c0_3 = arith.constant 0 : index
    %c0_4 = arith.constant 0 : index
    %4 = vector.load %arg4[%c0_3, %c0_4] : memref<16x128xf32, #tpu.memory_space<vmem>>, vector<16x128xf32>
    tpu.vector_store %arg4[%c0_3, %c0_4], %3 {strides = array<i32>} : memref<16x128xf32, #tpu.memory_space<vmem>>, vector<16x128xf32>,
    return
  }
  func.func @transform_0(%arg0: i32, %arg1: i32) -> (i32, i32) {
    %c0_i32 = arith.constant 0 : i32
    %c0_i32_0 = arith.constant 0 : i32
    return %arg0, %c0_i32 : i32, i32
  }
  func.func @transform_1(%arg0: i32, %arg1: i32) -> (i32, i32) {
    %c0_i32 = arith.constant 0 : i32
    %c0_i32_0 = arith.constant 0 : i32
    return %c0_i32, %arg1 : i32, i32
  }
  func.func @transform_2(%arg0: i32, %arg1: i32) -> (i32, i32) {
    %c0_i32 = arith.constant 0 : i32
    return %arg0, %arg1 : i32, i32
  }
}

</mosaic_0001>

<bundles_post_ra>
// kernel: _linear_core.1
= control target key start
LH: loop header
LB: loop body
LE: loop exit
PB: predicated region body
PF: predicated region fallthrough
CT: control target
= control target key end

     0   :  { %7 = vsyncpa [#allocation3], 0  ;;  %s184_s12 = smov [#allocation2]   ;;  %s185_s14 = smov 64   ;;  %s217_s0 = inlined_call_operand.vmem [shape: f32[16,128], index: 0, kind: input, shape index: {}]   ;;  %s218_s1 = inlined_call_operand.hbm [shape: bf16[128,128], index: 1, kind: input, shape index: {}]   ;;  %s219_s2 = inlined_call_operand.vmem [shape: f32[16,128], index: 2, kind: output, shape index: {}]  }
   0x1   :  { %s14_s11 = sshll.u32 %s218_s1, 4  ;;  %s16_s13 = sshll.u32 %s184_s12, 4  ;;  %s15_s11 = int_to_ptr.hbm [resolvable:$true] %s14_s11  ;;  %s17_s13 = int_to_ptr.vmem [resolvable:$true] %s16_s13 }
   0x2   :  { %s186_s15 = smov 4  }
   0x3   :  { %22 = dma.hbm_to_vmem [thread:$0]  %s15_s11, 1024, %s17_s13, [#allocation3], %s185_s14, %s185_s14, %s186_s15  }
   0x4   :  { %182 = dma.done.wait [#allocation3], 1024  }
   0x5   :  { %183 = vsyncadd [#allocation3], 4294966272  ;;  %v154_v0 = vld [vmem:[#allocation2 + $0x38] sm:$0xff]  ;;  %v153_v1 = vld [vmem:[#allocation2 + $0x30] sm:$0xff] }
   0x6   :  { %94 = vmatpush.bf16.msra.mxu0 %v154_v0  ;;  %v152_v2 = vld [vmem:[#allocation2 + $0x28] sm:$0xff]  ;;  %v151_v3 = vld [vmem:[#allocation2 + $0x20] sm:$0xff]  ;;  %v150_v4 = vld [vmem:[#allocation2 + $0x18] sm:$0xff] }
   0x7   :  { %v149_v5 = vld [vmem:[#allocation2 + $0x10] sm:$0xff]  ;;  %v148_v6 = vld [vmem:[#allocation2 + $0x8] sm:$0xff]  ;;  %v147_v7 = vld [vmem:[#allocation2] sm:$0xff] }
   0x8   :  { %v27_v8 = vld [vmem:[%s217_s0] sm:$0xff]  ;;  %v28_v9 = vld [vmem:[%s217_s0 + $0x8] sm:$0xff] }
   0x9   :  { %v29_v10 = vpack.c.bf16 %v28_v9, %v27_v8 }
   0xa   :  { %95 = vmatpush.bf16.msra.mxu0 %v153_v1 }
   0xe   :  { %96 = vmatpush.bf16.msra.mxu0 %v152_v2 }
  0x12   :  { %97 = vmatpush.bf16.msra.mxu0 %v151_v3 }
  0x16   :  { %98 = vmatpush.bf16.msra.mxu0 %v150_v4 }
  0x1a   :  { %99 = vmatpush.bf16.msra.mxu0 %v149_v5 }
  0x1e   :  { %100 = vmatpush.bf16.msra.mxu0 %v148_v6 }
  0x22   :  { %101 = vmatpush.bf16.msra.mxu0 %v147_v7 }
  0x25   :  { %102 = vmatmul.bf16.vlgmr.msra.gmra.mxu0 %v29_v10 }
  0xa2   :  { %v103_v11 = vpop.f32.mrf.mxu0 }
  0xa3   :  { %108 = vst [vmem:[%s219_s2] sm:$0xff] %v103_v11 }
  0xaa   :  { %v105_v12 = vpop.f32.mrf.mxu0 }
  0xab   :  { %109 = vst [vmem:[%s219_s2 + $0x8] sm:$0xff] %v105_v12 }
  0xac   :  { %114 = vsyncpa [#allocation3], 1 }

</bundles_post_ra>
